<compile_context>
chip_gen: v6e
topology: v6e:2x2x1
jax: 0.10.0
libtpu: 0.0.40
codegen_flags: <defaults>
</compile_context>

<pallas_src>
import functools
import math

import jax
import jax.numpy as jnp
from jax.experimental import pallas as pl
from jax.experimental.pallas import tpu as pltpu

_MASK_VALUE = -1e30  # finite "-inf" for padded n positions (avoids inf-inf NaN)


def _round_up(x: int, m: int) -> int:
    return ((x + m - 1) // m) * m


def _attention_kernel(x_ref, w1t_ref, w2t_ref,
                      logits_ref, acc_ref, m_ref, l_ref,
                      m_sc, l_sc, acc_sc,
                      *, tile_n, tiles_per_split, n_valid):
    """Grid = (num_splits, tiles_per_split); online softmax over the n axis.

    Each split keeps its own running (m, l, acc) in VMEM scratch and emits the
    partials at its last tile; the wrapper merges the splits and normalizes.
    """
    s = pl.program_id(0)
    i = pl.program_id(1)

    @pl.when(i == 0)
    def _init():
        m_sc[...] = jnp.full_like(m_sc, -jnp.inf)
        l_sc[...] = jnp.zeros_like(l_sc)
        acc_sc[...] = jnp.zeros_like(acc_sc)

    x = x_ref[...]                                   # (tile_n, in_p), matmul dtype

    # h^T = tanh(X @ w1^T): natural MXU orientation, f32 accumulate, f32 tanh.
    h_t = jnp.tanh(jnp.dot(x, w1t_ref[...], preferred_element_type=jnp.float32))
    # logits^T = h^T @ w2^T -> (tile_n, out_p); relayout only this small tile.
    logits_t = jnp.dot(h_t.astype(w2t_ref.dtype), w2t_ref[...],
                       preferred_element_type=jnp.float32)
    logits = logits_t.T                              # (out_p, tile_n), f32

    # Mask padded n positions so they contribute nothing to the softmax.
    pos = ((s * tiles_per_split + i) * tile_n
           + jax.lax.broadcasted_iota(jnp.int32, logits.shape, 1))
    logits = jnp.where(pos < n_valid, logits, _MASK_VALUE)

    # Tiled, lane-dense per-step store of the raw (masked) logits.  Final
    # softmax normalization happens in a tiny XLA epilogue, so nothing O(n)
    # is ever resident in VMEM and the writeback pipelines with compute.
    logits_ref[...] = logits

    # Online (flash-style) softmax update of this split's partial state.
    m_prev = m_sc[...]
    m_new = jnp.maximum(m_prev, jnp.max(logits, axis=-1, keepdims=True))
    alpha = jnp.exp(m_prev - m_new)
    p = jnp.exp(logits - m_new)                      # (out_p, tile_n), f32
    l_sc[...] = alpha * l_sc[...] + jnp.sum(p, axis=-1, keepdims=True)
    # p stays f32: out_p is below bf16's native (16,128) tile, so a bf16 cast
    # would only add packing relayouts; this matmul is tiny (out_p rows).
    acc_sc[...] = alpha * acc_sc[...] + jnp.dot(
        p, x.astype(jnp.float32), preferred_element_type=jnp.float32)
    m_sc[...] = m_new

    @pl.when(i == pl.num_programs(1) - 1)
    def _finalize():
        acc_ref[0] = acc_sc[...]
        m_ref[0] = m_sc[...]
        l_ref[0] = l_sc[...]


@functools.partial(jax.jit,
                   static_argnames=("tile_n", "matmul_dtype", "num_splits"))
def attention_forward(X, w1, w2, *, tile_n=512,
                      matmul_dtype=jnp.bfloat16, num_splits=2):
    n, in_feature = X.shape
    hidden, in_f2 = w1.shape
    out_feature, hid2 = w2.shape
    assert in_f2 == in_feature and hid2 == hidden

    mm_bytes = jnp.dtype(matmul_dtype).itemsize

    # Pad to MXU / lane friendly sizes (zero padding is an exact no-op for the
    # math; padded n positions are masked inside the kernel).
    in_p = _round_up(in_feature, 128)
    hid_p = _round_up(hidden, 128)
    out_p = _round_up(max(out_feature, 8), 8)

    # tile_n: lane multiple, no larger than the (padded) data, and keep the
    # double-buffered X tile well inside every generation's VMEM budget.
    tile_n = max(128, _round_up(tile_n, 128))
    tile_n = min(tile_n, _round_up(n, 128))
    max_tile = max(128, (8 * 1024 * 1024 // (2 * in_p * mm_bytes)) // 128 * 128)
    tile_n = min(tile_n, max_tile)

    n_tiles = _round_up(n, tile_n) // tile_n
    num_splits = max(1, min(num_splits, n_tiles))        # 2 -> v7x's 2 TCs
    tiles_per_split = _round_up(n_tiles, num_splits) // num_splits
    n_pad = num_splits * tiles_per_split * tile_n

    # Single-pass pad + cast directly into the matmul dtype (no double
    # materialization of X in HBM); skip entirely when already aligned.
    if n == n_pad and in_feature == in_p and X.dtype == matmul_dtype:
        x_p = X
    else:
        x_p = jnp.zeros((n_pad, in_p), matmul_dtype)
        x_p = x_p.at[:n, :in_feature].set(X.astype(matmul_dtype))
    w1t = jnp.zeros((in_p, hid_p), matmul_dtype)
    w1t = w1t.at[:in_feature, :hidden].set(jnp.transpose(w1).astype(matmul_dtype))
    w2t = jnp.zeros((hid_p, out_p), matmul_dtype)
    w2t = w2t.at[:hidden, :out_feature].set(jnp.transpose(w2).astype(matmul_dtype))

    flops = (2 * n_pad * in_p * hid_p        # X @ w1^T
             + 2 * n_pad * hid_p * out_p     # h^T @ w2^T
             + 2 * out_p * n_pad * in_p)     # p @ X
    transcendentals = n_pad * hid_p + 2 * out_p * n_pad   # tanh + exp
    bytes_accessed = (n_pad * in_p * mm_bytes
                      + (in_p * hid_p + hid_p * out_p) * mm_bytes
                      + out_p * n_pad * 4
                      + num_splits * out_p * (in_p + 2) * 4)

    # VMEM residency: double-buffered X tile + weights + tiled logits out +
    # per-split partial outputs + scratch.  All O(tile_n), independent of n.
    vmem_bytes = (2 * tile_n * in_p * mm_bytes
                  + 2 * (in_p * hid_p + hid_p * out_p) * mm_bytes
                  + 2 * out_p * tile_n * 4
                  + 2 * out_p * (in_p + 2) * 4
                  + out_p * (in_p + 2) * 4)
    compiler_kwargs = {}
    if vmem_bytes > 16 * 1024 * 1024:        # smallest default scoped limit (v5e)
        try:
            phys = int(getattr(pltpu.get_tpu_info(), "vmem_capacity_bytes",
                               64 * 1024 * 1024))
        except Exception:                    # pragma: no cover (non-TPU tracer)
            phys = 64 * 1024 * 1024          # conservative: v7x physical VMEM
        cap = max(16 * 1024 * 1024, phys - 12 * 1024 * 1024)  # compiler headroom
        compiler_kwargs["vmem_limit_bytes"] = int(
            min(max(vmem_bytes * 5 // 4, 16 * 1024 * 1024), cap))

    logits_pad, acc_parts, m_parts, l_parts = pl.pallas_call(
        functools.partial(_attention_kernel, tile_n=tile_n,
                          tiles_per_split=tiles_per_split, n_valid=n),
        out_shape=(
            jax.ShapeDtypeStruct((out_p, n_pad), jnp.float32),             # logits
            jax.ShapeDtypeStruct((num_splits, out_p, in_p), jnp.float32),  # acc
            jax.ShapeDtypeStruct((num_splits, out_p, 1), jnp.float32),     # m
            jax.ShapeDtypeStruct((num_splits, out_p, 1), jnp.float32),     # l
        ),
        grid_spec=pltpu.PrefetchScalarGridSpec(
            num_scalar_prefetch=0,
            grid=(num_splits, tiles_per_split),        # (n-split, n-tiles)
            in_specs=[
                pl.BlockSpec((tile_n, in_p),
                             lambda s, i: (s * tiles_per_split + i, 0)),   # X tile
                pl.BlockSpec((in_p, hid_p), lambda s, i: (0, 0)),          # w1^T
                pl.BlockSpec((hid_p, out_p), lambda s, i: (0, 0)),         # w2^T
            ],
            out_specs=[
                pl.BlockSpec((out_p, tile_n),
                             lambda s, i: (0, s * tiles_per_split + i)),   # logits
                pl.BlockSpec((1, out_p, in_p), lambda s, i: (s, 0, 0)),    # acc
                pl.BlockSpec((1, out_p, 1), lambda s, i: (s, 0, 0)),       # m
                pl.BlockSpec((1, out_p, 1), lambda s, i: (s, 0, 0)),       # l
            ],
            scratch_shapes=[
                pltpu.VMEM((out_p, 1), jnp.float32),       # running max m
                pltpu.VMEM((out_p, 1), jnp.float32),       # running sum l
                pltpu.VMEM((out_p, in_p), jnp.float32),    # running acc (p @ X)
            ],
        ),
        compiler_params=pltpu.CompilerParams(
            dimension_semantics=("parallel", "arbitrary"),
            **compiler_kwargs,
        ),
        cost_estimate=pl.CostEstimate(
            flops=flops,
            transcendentals=transcendentals,
            bytes_accessed=bytes_accessed,
        ),
    )(x_p, w1t, w2t)

    # Tiny fused XLA epilogue: merge per-split online-softmax partials and
    # normalize the attention map (elementwise over out_p x n, fully parallel).
    m_fin = jnp.max(m_parts, axis=0)                 # (out_p, 1)
    scale = jnp.exp(m_parts - m_fin)                 # (num_splits, out_p, 1)
    l_fin = jnp.sum(l_parts * scale, axis=0)         # (out_p, 1)
    acc_fin = jnp.sum(acc_parts * scale, axis=0)     # (out_p, in_p)
    inv_l = 1.0 / l_fin
    out = (acc_fin * inv_l)[:out_feature, :in_feature]
    attn = (jnp.exp(logits_pad - m_fin) * inv_l)[:out_feature, :n]
    return out, attn


def xavier_normal(key, shape):
    # torch.nn.init.xavier_normal_: std = sqrt(2 / (fan_in + fan_out))
    fan_out, fan_in = shape
    std = math.sqrt(2.0 / (fan_in + fan_out))
    return std * jax.random.normal(key, shape, dtype=jnp.float32)


def reference_forward(X, w1, w2):
    hp = jax.lax.Precision.HIGHEST
    h = jnp.tanh(jnp.matmul(w1, X.T, precision=hp))
    logits = jnp.matmul(w2, h, precision=hp)
    attn = jax.nn.softmax(logits, axis=-1)
    return jnp.matmul(attn, X, precision=hp), attn


if __name__ == "__main__":
    # Small shapes, deliberately not lane/tile aligned to exercise padding+mask.
    in_feature, hidden, out_feature = 96, 48, 4

    key = jax.random.PRNGKey(0)
    kx1, kx2, k1, k2 = jax.random.split(key, 4)
    w1 = xavier_normal(k1, (hidden, in_feature))
    w2 = xavier_normal(k2, (out_feature, hidden))

    # Case 1: single tile / single split (n=300).  f32 operands for tight
    # parity with the reference; bf16 is the production default on TPU MXUs.
    n1 = 300
    X1 = jax.random.normal(kx1, (n1, in_feature), dtype=jnp.float32)
    ref_out1, ref_attn1 = reference_forward(X1, w1, w2)
    out1, attn1 = attention_forward(X1, w1, w2, matmul_dtype=jnp.float32)
    out1, attn1 = jax.block_until_ready((out1, attn1))
    assert out1.shape == (out_feature, in_feature)
    assert attn1.shape == (out_feature, n1)
    assert jnp.allclose(jnp.sum(attn1, axis=-1), 1.0, atol=1e-4)
    assert jnp.allclose(out1, ref_out1, atol=1e-4, rtol=1e-4)
    assert jnp.allclose(attn1, ref_attn1, atol=1e-4, rtol=1e-4)

    # Case 2: multi-tile + 2-way n-split (exercises online softmax across
    # tiles, the tiled attn writeback, and the cross-split merge epilogue).
    n2 = 1000
    X2 = jax.random.normal(kx2, (n2, in_feature), dtype=jnp.float32)
    ref_out2, ref_attn2 = reference_forward(X2, w1, w2)
    out2, attn2 = attention_forward(X2, w1, w2, tile_n=256, num_splits=2,
                                    matmul_dtype=jnp.float32)
    out2, attn2 = jax.block_until_ready((out2, attn2))
    assert out2.shape == (out_feature, in_feature)
    assert attn2.shape == (out_feature, n2)
    assert jnp.allclose(jnp.sum(attn2, axis=-1), 1.0, atol=1e-4)
    assert jnp.allclose(out2, ref_out2, atol=1e-4, rtol=1e-4)
    assert jnp.allclose(attn2, ref_attn2, atol=1e-4, rtol=1e-4)

    print("KERNEL_OK")
</pallas_src>

<mosaic_0001>
module attributes {stable_mosaic.version = 11 : i64} {
  func.func @_attention_kernel(%arg0: i32, %arg1: i32, %arg2: memref<384x128xf32, #tpu.memory_space<vmem>>, %arg3: memref<128x128xf32, #tpu.memory_space<vmem>>, %arg4: memref<128x8xf32, #tpu.memory_space<vmem>>, %arg5: memref<8x384xf32, #tpu.memory_space<vmem>>, %arg6: memref<1x8x128xf32, #tpu.memory_space<vmem>>, %arg7: memref<1x8x1xf32, #tpu.memory_space<vmem>>, %arg8: memref<1x8x1xf32, #tpu.memory_space<vmem>>, %arg9: memref<8x1xf32, #tpu.memory_space<vmem>>, %arg10: memref<8x1xf32, #tpu.memory_space<vmem>>, %arg11: memref<8x128xf32, #tpu.memory_space<vmem>>) attributes {dimension_semantics = [#tpu.dimension_semantics<parallel>, #tpu.dimension_semantics<arbitrary>], iteration_bounds = array<i64: 1, 1>, scalar_prefetch = 0 : i64, scratch_operands = 3 : i64, tpu.core_type = #tpu.core_type<tc>, window_params = [{transform_indices = @transform_0, window_bounds = array<i64: 384, 128>}, {pipeline_mode = #tpu.pipeline_mode<synchronous>, transform_indices = @transform_1, window_bounds = array<i64: 128, 128>}, {pipeline_mode = #tpu.pipeline_mode<synchronous>, transform_indices = @transform_2, window_bounds = array<i64: 128, 8>}, {transform_indices = @transform_3, window_bounds = array<i64: 8, 384>}, {transform_indices = @transform_4, window_bounds = array<i64: 1, 8, 128>}, {transform_indices = @transform_5, window_bounds = array<i64: 1, 8, 1>}, {transform_indices = @transform_6, window_bounds = array<i64: 1, 8, 1>}]} {
    %c0_i32 = arith.constant 0 : i32
    %0 = arith.cmpi eq, %arg1, %c0_i32 : i32
    %1 = arith.extui %0 : i1 to i32
    %c0_i32_0 = arith.constant 0 : i32
    %2 = arith.cmpi ne, %1, %c0_i32_0 : i32
    scf.if %2 {
      %cst_27 = arith.constant 0xFF800000 : f32
      %46 = vector.broadcast %cst_27 : f32 to vector<8x1xf32>
      %c0_28 = arith.constant 0 : index
      %c0_29 = arith.constant 0 : index
      %47 = vector.load %arg9[%c0_28, %c0_29] : memref<8x1xf32, #tpu.memory_space<vmem>>, vector<8x1xf32>
      tpu.vector_store %arg9[%c0_28, %c0_29], %46 {strides = array<i32>} : memref<8x1xf32, #tpu.memory_space<vmem>>, vector<8x1xf32>,
      %cst_30 = arith.constant 0.000000e+00 : f32
      %48 = vector.broadcast %cst_30 : f32 to vector<8x1xf32>
      %c0_31 = arith.constant 0 : index
      %c0_32 = arith.constant 0 : index
      %49 = vector.load %arg10[%c0_31, %c0_32] : memref<8x1xf32, #tpu.memory_space<vmem>>, vector<8x1xf32>
      tpu.vector_store %arg10[%c0_31, %c0_32], %48 {strides = array<i32>} : memref<8x1xf32, #tpu.memory_space<vmem>>, vector<8x1xf32>,
      %cst_33 = arith.constant 0.000000e+00 : f32
      %50 = vector.broadcast %cst_33 : f32 to vector<8x128xf32>
      %c0_34 = arith.constant 0 : index
      %c0_35 = arith.constant 0 : index
      %51 = vector.load %arg11[%c0_34, %c0_35] : memref<8x128xf32, #tpu.memory_space<vmem>>, vector<8x128xf32>
      tpu.vector_store %arg11[%c0_34, %c0_35], %50 {strides = array<i32>} : memref<8x128xf32, #tpu.memory_space<vmem>>, vector<8x128xf32>,
    } else {
    }
    %c0 = arith.constant 0 : index
    %c0_1 = arith.constant 0 : index
    %3 = vector.load %arg2[%c0, %c0_1] : memref<384x128xf32, #tpu.memory_space<vmem>>, vector<384x128xf32>
    %c0_2 = arith.constant 0 : index
    %c0_3 = arith.constant 0 : index
    %4 = vector.load %arg3[%c0_2, %c0_3] : memref<128x128xf32, #tpu.memory_space<vmem>>, vector<128x128xf32>
    %cst = arith.constant dense<0.000000e+00> : vector<384x128xf32>
    %5 = tpu.matmul %3, %4, %cst {dimension_numbers = #tpu.dot_dimension_numbers<[1], [0], [0], [1], [0, 0, 1, 1], [], []>} : vector<384x128xf32>, vector<128x128xf32>, vector<384x128xf32> -> vector<384x128xf32>
    %6 = math.tanh %5 : vector<384x128xf32>
    %c0_4 = arith.constant 0 : index
    %c0_5 = arith.constant 0 : index
    %7 = vector.load %arg4[%c0_4, %c0_5] : memref<128x8xf32, #tpu.memory_space<vmem>>, vector<128x8xf32>
    %cst_6 = arith.constant dense<0.000000e+00> : vector<384x8xf32>
    %8 = tpu.matmul %6, %7, %cst_6 {dimension_numbers = #tpu.dot_dimension_numbers<[1], [0], [0], [1], [0, 0, 1, 1], [], []>} : vector<384x128xf32>, vector<128x8xf32>, vector<384x8xf32> -> vector<384x8xf32>
    %9 = tpu.transpose %8, [1, 0] : vector<384x8xf32> -> vector<8x384xf32>
    %c1_i32 = arith.constant 1 : i32
    %10 = arith.muli %arg0, %c1_i32 : i32
    %11 = arith.addi %10, %arg1 : i32
    %c384_i32 = arith.constant 384 : i32
    %12 = arith.muli %11, %c384_i32 : i32
    %13 = tpu.iota {dimensions = array<i32: 1>} : vector<8x384xi32>
    %14 = vector.broadcast %12 : i32 to vector<8x384xi32>
    %15 = arith.addi %14, %13 : vector<8x384xi32>
    %c300_i32 = arith.constant 300 : i32
    %16 = vector.broadcast %c300_i32 : i32 to vector<8x384xi32>
    %17 = arith.cmpi slt, %15, %16 : vector<8x384xi32>
    %cst_7 = arith.constant -1.000000e+30 : f32
    %18 = vector.broadcast %cst_7 : f32 to vector<8x384xf32>
    %19 = arith.select %17, %9, %18 : vector<8x384xi1>, vector<8x384xf32>
    %c0_8 = arith.constant 0 : index
    %c0_9 = arith.constant 0 : index
    %20 = vector.load %arg5[%c0_8, %c0_9] : memref<8x384xf32, #tpu.memory_space<vmem>>, vector<8x384xf32>
    tpu.vector_store %arg5[%c0_8, %c0_9], %19 {strides = array<i32>} : memref<8x384xf32, #tpu.memory_space<vmem>>, vector<8x384xf32>,
    %c0_10 = arith.constant 0 : index
    %c0_11 = arith.constant 0 : index
    %21 = vector.load %arg9[%c0_10, %c0_11] : memref<8x1xf32, #tpu.memory_space<vmem>>, vector<8x1xf32>
    %cst_12 = arith.constant dense<0xFF800000> : vector<8xf32>
    %22 = vector.multi_reduction <maximumf>, %19, %cst_12 [1] : vector<8x384xf32> to vector<8xf32>
    %23 = vector.shape_cast %22 : vector<8xf32> to vector<8x1xf32>
    %24 = arith.maximumf %21, %23 : vector<8x1xf32>
    %25 = arith.subf %21, %24 : vector<8x1xf32>
    %26 = math.exp %25 : vector<8x1xf32>
    %27 = vector.broadcast %24 : vector<8x1xf32> to vector<8x384xf32>
    %28 = arith.subf %19, %27 : vector<8x384xf32>
    %29 = math.exp %28 : vector<8x384xf32>
    %c0_13 = arith.constant 0 : index
    %c0_14 = arith.constant 0 : index
    %30 = vector.load %arg10[%c0_13, %c0_14] : memref<8x1xf32, #tpu.memory_space<vmem>>, vector<8x1xf32>
    %31 = arith.mulf %26, %30 : vector<8x1xf32>
    %cst_15 = arith.constant dense<0.000000e+00> : vector<8xf32>
    %32 = vector.multi_reduction <add>, %29, %cst_15 [1] : vector<8x384xf32> to vector<8xf32>
    %33 = vector.shape_cast %32 : vector<8xf32> to vector<8x1xf32>
    %34 = arith.addf %31, %33 : vector<8x1xf32>
    %c0_16 = arith.constant 0 : index
    %c0_17 = arith.constant 0 : index
    %35 = vector.load %arg10[%c0_16, %c0_17] : memref<8x1xf32, #tpu.memory_space<vmem>>, vector<8x1xf32>
    tpu.vector_store %arg10[%c0_16, %c0_17], %34 {strides = array<i32>} : memref<8x1xf32, #tpu.memory_space<vmem>>, vector<8x1xf32>,
    %c0_18 = arith.constant 0 : index
    %c0_19 = arith.constant 0 : index
    %36 = vector.load %arg11[%c0_18, %c0_19] : memref<8x128xf32, #tpu.memory_space<vmem>>, vector<8x128xf32>
    %37 = vector.broadcast %26 : vector<8x1xf32> to vector<8x128xf32>
    %38 = arith.mulf %37, %36 : vector<8x128xf32>
    %cst_20 = arith.constant dense<0.000000e+00> : vector<8x128xf32>
    %39 = tpu.matmul %29, %3, %cst_20 {dimension_numbers = #tpu.dot_dimension_numbers<[1], [0], [0], [1], [0, 0, 1, 1], [], []>} : vector<8x384xf32>, vector<384x128xf32>, vector<8x128xf32> -> vector<8x128xf32>
    %40 = arith.addf %38, %39 : vector<8x128xf32>
    %c0_21 = arith.constant 0 : index
    %c0_22 = arith.constant 0 : index
    %41 = vector.load %arg11[%c0_21, %c0_22] : memref<8x128xf32, #tpu.memory_space<vmem>>, vector<8x128xf32>
    tpu.vector_store %arg11[%c0_21, %c0_22], %40 {strides = array<i32>} : memref<8x128xf32, #tpu.memory_space<vmem>>, vector<8x128xf32>,
    %c0_23 = arith.constant 0 : index
    %c0_24 = arith.constant 0 : index
    %42 = vector.load %arg9[%c0_23, %c0_24] : memref<8x1xf32, #tpu.memory_space<vmem>>, vector<8x1xf32>
    tpu.vector_store %arg9[%c0_23, %c0_24], %24 {strides = array<i32>} : memref<8x1xf32, #tpu.memory_space<vmem>>, vector<8x1xf32>,
    %c0_i32_25 = arith.constant 0 : i32
    %43 = arith.cmpi eq, %arg1, %c0_i32_25 : i32
    %44 = arith.extui %43 : i1 to i32
    %c0_i32_26 = arith.constant 0 : i32
    %45 = arith.cmpi ne, %44, %c0_i32_26 : i32
    scf.if %45 {
      %c0_27 = arith.constant 0 : index
      %c0_28 = arith.constant 0 : index
      %46 = vector.load %arg11[%c0_27, %c0_28] : memref<8x128xf32, #tpu.memory_space<vmem>>, vector<8x128xf32>
      %c0_29 = arith.constant 0 : index
      %c0_30 = arith.constant 0 : index
      %c0_31 = arith.constant 0 : index
      %47 = vector.load %arg6[%c0_29, %c0_30, %c0_31] : memref<1x8x128xf32, #tpu.memory_space<vmem>>, vector<1x8x128xf32>
      %48 = vector.shape_cast %47 : vector<1x8x128xf32> to vector<8x128xf32>
      %49 = vector.shape_cast %46 : vector<8x128xf32> to vector<1x8x128xf32>
      tpu.vector_store %arg6[%c0_29, %c0_30, %c0_31], %49 {strides = array<i32>} : memref<1x8x128xf32, #tpu.memory_space<vmem>>, vector<1x8x128xf32>,
      %c0_32 = arith.constant 0 : index
      %c0_33 = arith.constant 0 : index
      %50 = vector.load %arg9[%c0_32, %c0_33] : memref<8x1xf32, #tpu.memory_space<vmem>>, vector<8x1xf32>
      %c0_34 = arith.constant 0 : index
      %c0_35 = arith.constant 0 : index
      %c0_36 = arith.constant 0 : index
      %51 = vector.load %arg7[%c0_34, %c0_35, %c0_36] : memref<1x8x1xf32, #tpu.memory_space<vmem>>, vector<1x8x1xf32>
      %52 = vector.shape_cast %51 : vector<1x8x1xf32> to vector<8x1xf32>
      %53 = vector.shape_cast %50 : vector<8x1xf32> to vector<1x8x1xf32>
      tpu.vector_store %arg7[%c0_34, %c0_35, %c0_36], %53 {strides = array<i32>} : memref<1x8x1xf32, #tpu.memory_space<vmem>>, vector<1x8x1xf32>,
      %c0_37 = arith.constant 0 : index
      %c0_38 = arith.constant 0 : index
      %54 = vector.load %arg10[%c0_37, %c0_38] : memref<8x1xf32, #tpu.memory_space<vmem>>, vector<8x1xf32>
      %c0_39 = arith.constant 0 : index
      %c0_40 = arith.constant 0 : index
      %c0_41 = arith.constant 0 : index
      %55 = vector.load %arg8[%c0_39, %c0_40, %c0_41] : memref<1x8x1xf32, #tpu.memory_space<vmem>>, vector<1x8x1xf32>
      %56 = vector.shape_cast %55 : vector<1x8x1xf32> to vector<8x1xf32>
      %57 = vector.shape_cast %54 : vector<8x1xf32> to vector<1x8x1xf32>
      tpu.vector_store %arg8[%c0_39, %c0_40, %c0_41], %57 {strides = array<i32>} : memref<1x8x1xf32, #tpu.memory_space<vmem>>, vector<1x8x1xf32>,
    } else {
    }
    return
  }
  func.func @transform_0(%arg0: i32, %arg1: i32) -> (i32, i32) {
    %c1_i32 = arith.constant 1 : i32
    %0 = arith.muli %arg0, %c1_i32 : i32
    %1 = arith.addi %0, %arg1 : i32
    %c0_i32 = arith.constant 0 : i32
    %c0_i32_0 = arith.constant 0 : i32
    return %1, %c0_i32 : i32, i32
  }
  func.func @transform_1(%arg0: i32, %arg1: i32) -> (i32, i32) {
    %c0_i32 = arith.constant 0 : i32
    %c0_i32_0 = arith.constant 0 : i32
    %c0_i32_1 = arith.constant 0 : i32
    return %c0_i32, %c0_i32_0 : i32, i32
  }
  func.func @transform_2(%arg0: i32, %arg1: i32) -> (i32, i32) {
    %c0_i32 = arith.constant 0 : i32
    %c0_i32_0 = arith.constant 0 : i32
    %c0_i32_1 = arith.constant 0 : i32
    return %c0_i32, %c0_i32_0 : i32, i32
  }
  func.func @transform_3(%arg0: i32, %arg1: i32) -> (i32, i32) {
    %c1_i32 = arith.constant 1 : i32
    %0 = arith.muli %arg0, %c1_i32 : i32
    %1 = arith.addi %0, %arg1 : i32
    %c0_i32 = arith.constant 0 : i32
    %c0_i32_0 = arith.constant 0 : i32
    return %c0_i32, %1 : i32, i32
  }
  func.func @transform_4(%arg0: i32, %arg1: i32) -> (i32, i32, i32) {
    %c0_i32 = arith.constant 0 : i32
    %c0_i32_0 = arith.constant 0 : i32
    %c0_i32_1 = arith.constant 0 : i32
    return %arg0, %c0_i32, %c0_i32_0 : i32, i32, i32
  }
  func.func @transform_5(%arg0: i32, %arg1: i32) -> (i32, i32, i32) {
    %c0_i32 = arith.constant 0 : i32
    %c0_i32_0 = arith.constant 0 : i32
    %c0_i32_1 = arith.constant 0 : i32
    return %arg0, %c0_i32, %c0_i32_0 : i32, i32, i32
  }
  func.func @transform_6(%arg0: i32, %arg1: i32) -> (i32, i32, i32) {
    %c0_i32 = arith.constant 0 : i32
    %c0_i32_0 = arith.constant 0 : i32
    %c0_i32_1 = arith.constant 0 : i32
    return %arg0, %c0_i32, %c0_i32_0 : i32, i32, i32
  }
}

</mosaic_0001>

<bundles_post_ra>
// kernel: attention_forward.1
= control target key start
LH: loop header
LB: loop body
LE: loop exit
PB: predicated region body
PF: predicated region fallthrough
CT: control target
= control target key end

     0   :  { %vm58_vm0 = vcmask 7168   ;;  %vm1686_vm2 = vmmov 0   ;;  %s2096_s1 = inlined_call_operand.vmem [shape: f32[128,128], index: 1, kind: input, shape index: {}]   ;;  %s2097_s0 = inlined_call_operand.vmem [shape: f32[384,128], index: 0, kind: input, shape index: {}]   ;;  %s2098_s2 = inlined_call_operand.vmem [shape: f32[128,8], index: 2, kind: input, shape index: {}]   ;;  %s2099_s3 = inlined_call_operand.vmem [shape: f32[8,384], index: 3, kind: output, shape index: {0}]   ;;  %s2100_s5 = inlined_call_operand.vmem [shape: f32[1,8,1], index: 5, kind: output, shape index: {2}]   ;;  %s2101_s6 = inlined_call_operand.vmem [shape: f32[1,8,1], index: 6, kind: output, shape index: {3}]   ;;  %s2102_s4 = inlined_call_operand.vmem [shape: f32[1,8,128], index: 4, kind: output, shape index: {1}]  }
   0x1   :  { %v125_v0 = vld [vmem:[%s2096_s1 + $0x78] sm:$0xff]  ;;  %v124_v1 = vld [vmem:[%s2096_s1 + $0x70] sm:$0xff]  ;;  %v123_v2 = vld [vmem:[%s2096_s1 + $0x68] sm:$0xff] }
   0x2   :  { %1330 = vmatprep.subr.mxu0 %v125_v0  ;;  %v122_v3 = vld [vmem:[%s2096_s1 + $0x60] sm:$0xff]  ;;  %v121_v5 = vld [vmem:[%s2096_s1 + $0x58] sm:$0xff]  ;;  %v120_v6 = vld [vmem:[%s2096_s1 + $0x50] sm:$0xff] }
   0x3   :  { %1331 = vmatpush3.msra.mxu0 %v125_v0  ;;  %v1737_v4 = vld [vmem:[%s2097_s0] sm:$0xff]  ;;  %v119_v7 = vld [vmem:[%s2096_s1 + $0x48] sm:$0xff]  ;;  %v117_v9 = vld [vmem:[%s2096_s1 + $0x38] sm:$0xff] }
   0x4   :  { %1332 = vmatprep.subr.mxu0 %v124_v1  ;;  %1362 = vmatprep.mubr.f32.mxu0 %v1737_v4  ;;  %v118_v8 = vld [vmem:[%s2096_s1 + $0x40] sm:$0xff]  ;;  %v116_v10 = vld [vmem:[%s2096_s1 + $0x30] sm:$0xff]  ;;  %v115_v11 = vld [vmem:[%s2096_s1 + $0x28] sm:$0xff] }
   0x5   :  { %1333 = vmatpush3.msra.mxu0 %v124_v1  ;;  %v114_v12 = vld [vmem:[%s2096_s1 + $0x20] sm:$0xff]  ;;  %v494_v13 = vld [vmem:[%s2098_s2 + $0x78] sm:$0xff]  ;;  %v493_v14 = vld [vmem:[%s2098_s2 + $0x70] sm:$0xff] }
   0x6   :  { %1334 = vmatprep.subr.mxu0 %v123_v2  ;;  %v113_v15 = vld [vmem:[%s2096_s1 + $0x18] sm:$0xff]  ;;  %1434 = vmatprep.subr.mxu1 %v494_v13  ;;  %v492_v16 = vld [vmem:[%s2098_s2 + $0x68] sm:$0xff]  ;;  %v112_v17 = vld [vmem:[%s2096_s1 + $0x10] sm:$0xff] }
   0x7   :  { %1335 = vmatpush3.msra.mxu0 %v123_v2  ;;  %1435 = vmatpush3.msra.mxu1 %v494_v13  ;;  %v491_v18 = vld [vmem:[%s2098_s2 + $0x60] sm:$0xff]  ;;  %v111_v19 = vld [vmem:[%s2096_s1 + $0x8] sm:$0xff]  ;;  %v490_v20 = vld [vmem:[%s2098_s2 + $0x58] sm:$0xff] }
   0x8   :  { %1336 = vmatprep.subr.mxu0 %v122_v3  ;;  %1436 = vmatprep.subr.mxu1 %v493_v14  ;;  %v110_v21 = vld [vmem:[%s2096_s1] sm:$0xff]  ;;  %v489_v22 = vld [vmem:[%s2098_s2 + $0x50] sm:$0xff]  ;;  %v1797_v23 = vld [vmem:[%s2097_s0 + $0x8] sm:$0xff] }
   0x9   :  { %1337 = vmatpush3.msra.mxu0 %v122_v3  ;;  %1437 = vmatpush3.msra.mxu1 %v493_v14  ;;  %v1802_v24 = vld [vmem:[%s2097_s0 + $0x10] sm:$0xff]  ;;  %v488_v25 = vld [vmem:[%s2098_s2 + $0x48] sm:$0xff]  ;;  %v1812_v26 = vld [vmem:[%s2097_s0 + $0x18] sm:$0xff] }
   0xa   :  { %1338 = vmatprep.subr.mxu0 %v121_v5  ;;  %1438 = vmatprep.subr.mxu1 %v492_v16  ;;  %v1817_v27 = vld [vmem:[%s2097_s0 + $0xf8] sm:$0xff]  ;;  %v66_v28 = vld [vmem:[%s2097_s0 + $0x20] sm:$0xff]  ;;  %v1831_v30 = vld [vmem:[%s2097_s0 + $0xf0] sm:$0xff] }
   0xb   :  { %1339 = vmatpush3.msra.mxu0 %v121_v5  ;;  %1439 = vmatpush3.msra.mxu1 %v492_v16  ;;  %v1825_v29 = vld [vmem:[%s2097_s0 + $0x78] sm:$0xff]  ;;  %v76_v31 = vld [vmem:[%s2097_s0 + $0x70] sm:$0xff]  ;;  %v67_v32 = vld [vmem:[%s2097_s0 + $0x28] sm:$0xff] }
   0xc   :  { %1340 = vmatprep.subr.mxu0 %v120_v6  ;;  %1440 = vmatprep.subr.mxu1 %v491_v18  ;;  %v1845_v33 = vld [vmem:[%s2097_s0 + $0xe8] sm:$0xff]  ;;  %v68_v34 = vld [vmem:[%s2097_s0 + $0x30] sm:$0xff]  ;;  %v1857_v36 = vld [vmem:[%s2097_s0 + $0xe0] sm:$0xff] }
   0xd   :  { %1341 = vmatpush3.msra.mxu0 %v120_v6  ;;  %1441 = vmatpush3.msra.mxu1 %v491_v18  ;;  %v75_v35 = vld [vmem:[%s2097_s0 + $0x68] sm:$0xff]  ;;  %v74_v37 = vld [vmem:[%s2097_s0 + $0x60] sm:$0xff]  ;;  %v69_v38 = vld [vmem:[%s2097_s0 + $0x38] sm:$0xff] }
   0xe   :  { %1342 = vmatprep.subr.mxu0 %v119_v7  ;;  %1442 = vmatprep.subr.mxu1 %v490_v20  ;;  %v89_v39 = vld [vmem:[%s2097_s0 + $0xd8] sm:$0xff]  ;;  %v70_v40 = vld [vmem:[%s2097_s0 + $0x40] sm:$0xff]  ;;  %v88_v42 = vld [vmem:[%s2097_s0 + $0xd0] sm:$0xff] }
   0xf   :  { %1343 = vmatpush3.msra.mxu0 %v119_v7  ;;  %1443 = vmatpush3.msra.mxu1 %v490_v20  ;;  %v73_v41 = vld [vmem:[%s2097_s0 + $0x58] sm:$0xff]  ;;  %v72_v43 = vld [vmem:[%s2097_s0 + $0x50] sm:$0xff]  ;;  %v71_v44 = vld [vmem:[%s2097_s0 + $0x48] sm:$0xff] }
  0x10   :  { %1344 = vmatprep.subr.mxu0 %v118_v8  ;;  %1444 = vmatprep.subr.mxu1 %v489_v22  ;;  %v87_v45 = vld [vmem:[%s2097_s0 + $0xc8] sm:$0xff]  ;;  %v86_v46 = vld [vmem:[%s2097_s0 + $0xc0] sm:$0xff]  ;;  %v85_v47 = vld [vmem:[%s2097_s0 + $0xb8] sm:$0xff] }
  0x11   :  { %1345 = vmatpush3.msra.mxu0 %v118_v8  ;;  %1445 = vmatpush3.msra.mxu1 %v489_v22  ;;  %v84_v48 = vld [vmem:[%s2097_s0 + $0xb0] sm:$0xff]  ;;  %v83_v49 = vld [vmem:[%s2097_s0 + $0xa8] sm:$0xff]  ;;  %v82_v50 = vld [vmem:[%s2097_s0 + $0xa0] sm:$0xff] }
  0x12   :  { %1346 = vmatprep.subr.mxu0 %v117_v9  ;;  %1446 = vmatprep.subr.mxu1 %v488_v25  ;;  %v81_v51 = vld [vmem:[%s2097_s0 + $0x98] sm:$0xff]  ;;  %v78_v52 = vld [vmem:[%s2097_s0 + $0x80] sm:$0xff]  ;;  %v80_v53 = vld [vmem:[%s2097_s0 + $0x90] sm:$0xff] }
  0x13   :  { %1347 = vmatpush3.msra.mxu0 %v117_v9  ;;  %1447 = vmatpush3.msra.mxu1 %v488_v25  ;;  %v79_v54 = vld [vmem:[%s2097_s0 + $0x88] sm:$0xff]  ;;  %v1925_v55 = vld [vmem:[%s2097_s0 + $0x100] sm:$0xff]  ;;  %v1937_v57 = vld [vmem:[%s2097_s0 + $0x110] sm:$0xff] }
  0x14   :  { %1348 = vmatprep.subr.mxu0 %v116_v10  ;;  %v1932_v56 = vld [vmem:[%s2097_s0 + $0x108] sm:$0xff]  ;;  %v487_v58 = vld [vmem:[%s2098_s2 + $0x40] sm:$0xff]  ;;  %v1947_v59 = vld [vmem:[%s2097_s0 + $0x118] sm:$0xff] }
  0x15   :  { %1349 = vmatpush3.msra.mxu0 %v116_v10  ;;  %1448 = vmatprep.subr.mxu1 %v487_v58  ;;  %v486_v60 = vld [vmem:[%s2098_s2 + $0x38] sm:$0xff]  ;;  %v1955_v61 = vld [vmem:[%s2097_s0 + $0x120] sm:$0xff]  ;;  %v485_v62 = vld [vmem:[%s2098_s2 + $0x30] sm:$0xff] }
  0x16   :  { %1350 = vmatprep.subr.mxu0 %v115_v11  ;;  %1449 = vmatpush3.msra.mxu1 %v487_v58  ;;  %v1965_v63 = vld [vmem:[%s2097_s0 + $0x128] sm:$0xff]  ;;  %v1973_v1 = vld [vmem:[%s2097_s0 + $0x130] sm:$0xff]  ;;  %v483_v2 = vld [vmem:[%s2098_s2 + $0x20] sm:$0xff] }
  0x17   :  { %1351 = vmatpush3.msra.mxu0 %v115_v11  ;;  %1450 = vmatprep.subr.mxu1 %v486_v60  ;;  %v484_v0 = vld [vmem:[%s2098_s2 + $0x28] sm:$0xff]  ;;  %v1983_v3 = vld [vmem:[%s2097_s0 + $0x138] sm:$0xff]  ;;  %v1991_v5 = vld [vmem:[%s2097_s0 + $0x140] sm:$0xff] }
  0x18   :  { %1352 = vmatprep.subr.mxu0 %v114_v12  ;;  %1451 = vmatpush3.msra.mxu1 %v486_v60  ;;  %v481_v6 = vld [vmem:[%s2098_s2 + $0x10] sm:$0xff]  ;;  %v2001_v7 = vld [vmem:[%s2097_s0 + $0x148] sm:$0xff]  ;;  %v479_v10 = vld [vmem:[%s2098_s2] sm:$0xff] }
  0x19   :  { %1353 = vmatpush3.msra.mxu0 %v114_v12  ;;  %1452 = vmatprep.subr.mxu1 %v485_v62  ;;  %v480_v8 = vld [vmem:[%s2098_s2 + $0x8] sm:$0xff]  ;;  %v2009_v9 = vld [vmem:[%s2097_s0 + $0x150] sm:$0xff]  ;;  %v2019_v11 = vld [vmem:[%s2097_s0 + $0x158] sm:$0xff] }
  0x1a   :  { %1354 = vmatprep.subr.mxu0 %v113_v15  ;;  %1453 = vmatpush3.msra.mxu1 %v485_v62  ;;  %v2024_v12 = vld [vmem:[%s2097_s0 + $0x160] sm:$0xff]  ;;  %v2031_v13 = vld [vmem:[%s2097_s0 + $0x168] sm:$0xff]  ;;  %v2036_v14 = vld [vmem:[%s2097_s0 + $0x170] sm:$0xff] }
  0x1b   :  { %1355 = vmatpush3.msra.mxu0 %v113_v15  ;;  %1454 = vmatprep.subr.mxu1 %v484_v0  ;;  %v2043_v15 = vld [vmem:[%s2097_s0 + $0x178] sm:$0xff] }
  0x1c   :  { %1356 = vmatprep.subr.mxu0 %v112_v17  ;;  %1455 = vmatpush3.msra.mxu1 %v484_v0 }
  0x1d   :  { %1357 = vmatpush3.msra.mxu0 %v112_v17  ;;  %1456 = vmatprep.subr.mxu1 %v483_v2 }
  0x1e   :  { %1358 = vmatprep.subr.mxu0 %v111_v19  ;;  %1457 = vmatpush3.msra.mxu1 %v483_v2 }
  0x1f   :  { %1359 = vmatpush3.msra.mxu0 %v111_v19 }
  0x20   :  { %1360 = vmatprep.subr.mxu0 %v110_v21 }
  0x21   :  { %1361 = vmatpush3.msra.mxu0 %v110_v21 }
  0x22   :  { %1363 = vmatmul.mubr.f32.vlgmr.msra.gmra.mxu0 %v1797_v23  ;;  %1278 = vmatprep.subr.mxu0 %v1817_v27 }
  0x23   :  { %1365 = vmatprep.mubr.f32.mxu0 %v1802_v24  ;;  %1279 = vmatpush3.msra.mxu0 %v1825_v29 }
  0x24   :  { %1280 = vmatprep.subr.mxu0 %v1831_v30 }
  0x25   :  { %1281 = vmatpush3.msra.mxu0 %v76_v31 }
  0x26   :  { %1366 = vmatmul.mubr.f32.gmra.mxu0 %v1812_v26  ;;  %1282 = vmatprep.subr.mxu0 %v1845_v33 }
  0x27   :  { %1368 = vmatprep.mubr.f32.mxu0 %v66_v28  ;;  %1283 = vmatpush3.msra.mxu0 %v75_v35 }
  0x28   :  { %1284 = vmatprep.subr.mxu0 %v1857_v36 }
  0x29   :  { %1285 = vmatpush3.msra.mxu0 %v74_v37 }
  0x2a   :  { %1369 = vmatmul.mubr.f32.gmra.mxu0 %v67_v32  ;;  %1286 = vmatprep.subr.mxu0 %v89_v39 }
  0x2b   :  { %1371 = vmatprep.mubr.f32.mxu0 %v68_v34  ;;  %1287 = vmatpush3.msra.mxu0 %v73_v41 }
  0x2c   :  { %1288 = vmatprep.subr.mxu0 %v88_v42 }
  0x2d   :  { %1289 = vmatpush3.msra.mxu0 %v72_v43 }
  0x2e   :  { %1372 = vmatmul.mubr.f32.gmra.mxu0 %v69_v38  ;;  %1290 = vmatprep.subr.mxu0 %v87_v45 }
  0x2f   :  { %1374 = vmatprep.mubr.f32.mxu0 %v70_v40  ;;  %1291 = vmatpush3.msra.mxu0 %v71_v44 }
  0x30   :  { %1292 = vmatprep.subr.mxu0 %v86_v46 }
  0x31   :  { %1293 = vmatpush3.msra.mxu0 %v70_v40 }
  0x32   :  { %1375 = vmatmul.mubr.f32.gmra.mxu0 %v71_v44  ;;  %1294 = vmatprep.subr.mxu0 %v85_v47 }
  0x33   :  { %1377 = vmatprep.mubr.f32.mxu0 %v72_v43  ;;  %1295 = vmatpush3.msra.mxu0 %v69_v38 }
  0x34   :  { %1296 = vmatprep.subr.mxu0 %v84_v48 }
  0x35   :  { %1297 = vmatpush3.msra.mxu0 %v68_v34 }
  0x36   :  { %1378 = vmatmul.mubr.f32.gmra.mxu0 %v73_v41  ;;  %1298 = vmatprep.subr.mxu0 %v83_v49 }
  0x37   :  { %1380 = vmatprep.mubr.f32.mxu0 %v74_v37  ;;  %1299 = vmatpush3.msra.mxu0 %v67_v32 }
  0x38   :  { %1300 = vmatprep.subr.mxu0 %v82_v50 }
  0x39   :  { %1301 = vmatpush3.msra.mxu0 %v66_v28 }
  0x3a   :  { %1381 = vmatmul.mubr.f32.gmra.mxu0 %v75_v35  ;;  %1302 = vmatprep.subr.mxu0 %v81_v51 }
  0x3b   :  { %1383 = vmatprep.mubr.f32.mxu0 %v76_v31  ;;  %1303 = vmatpush3.msra.mxu0 %v1812_v26 }
  0x3c   :  { %1304 = vmatprep.subr.mxu0 %v80_v53 }
  0x3d   :  { %1305 = vmatpush3.msra.mxu0 %v1802_v24 }
  0x3e   :  { %1384 = vmatmul.mubr.f32.gmra.mxu0 %v1825_v29  ;;  %1306 = vmatprep.subr.mxu0 %v79_v54 }
  0x3f   :  { %1386 = vmatprep.mubr.f32.mxu0 %v78_v52  ;;  %1307 = vmatpush3.msra.mxu0 %v1797_v23 }
  0x40   :  { %1308 = vmatprep.subr.mxu0 %v78_v52 }
  0x41   :  { %1309 = vmatpush3.msra.mxu0 %v1737_v4  ;;  %v482_v4 = vld [vmem:[%s2098_s2 + $0x18] sm:$0xff] }
  0x42   :  { %1387 = vmatmul.mubr.f32.gmra.mxu0 %v79_v54  ;;  %1458 = vmatprep.subr.mxu1 %v482_v4 }
  0x43   :  { %1389 = vmatprep.mubr.f32.mxu0 %v80_v53  ;;  %1459 = vmatpush3.msra.mxu1 %v482_v4 }
  0x44   :  { %1460 = vmatprep.subr.mxu1 %v481_v6 }
  0x45   :  { %1461 = vmatpush3.msra.mxu1 %v481_v6 }
  0x46   :  { %1390 = vmatmul.mubr.f32.gmra.mxu0 %v81_v51  ;;  %1462 = vmatprep.subr.mxu1 %v480_v8 }
  0x47   :  { %1392 = vmatprep.mubr.f32.mxu0 %v82_v50  ;;  %1463 = vmatpush3.msra.mxu1 %v480_v8 }
  0x48   :  { %1464 = vmatprep.subr.mxu1 %v479_v10 }
  0x49   :  { %1465 = vmatpush3.msra.mxu1 %v479_v10 }
  0x4a   :  { %1393 = vmatmul.mubr.f32.gmra.mxu0 %v83_v49 }
  0x4b   :  { %1395 = vmatprep.mubr.f32.mxu0 %v84_v48 }
  0x4e   :  { %1396 = vmatmul.mubr.f32.gmra.mxu0 %v85_v47 }
  0x4f   :  { %1398 = vmatprep.mubr.f32.mxu0 %v86_v46 }
  0x52   :  { %1399 = vmatmul.mubr.f32.gmra.mxu0 %v87_v45 }
  0x53   :  { %1401 = vmatprep.mubr.f32.mxu0 %v88_v42 }
  0x56   :  { %1402 = vmatmul.mubr.f32.gmra.mxu0 %v89_v39 }
  0x57   :  { %1404 = vmatprep.mubr.f32.mxu0 %v1857_v36 }
  0x5a   :  { %1405 = vmatmul.mubr.f32.gmra.mxu0 %v1845_v33 }
  0x5b   :  { %1407 = vmatprep.mubr.f32.mxu0 %v1831_v30 }
  0x5e   :  { %1408 = vmatmul.mubr.f32.gmra.mxu0 %v1817_v27 }
  0x5f   :  { %1410 = vmatprep.mubr.f32.mxu0 %v1925_v55 }
  0x62   :  { %1411 = vmatmul.mubr.f32.gmra.mxu0 %v1932_v56 }
  0x63   :  { %1413 = vmatprep.mubr.f32.mxu0 %v1937_v57 }
  0x66   :  { %1414 = vmatmul.mubr.f32.gmra.mxu0 %v1947_v59 }
  0x67   :  { %1416 = vmatprep.mubr.f32.mxu0 %v1955_v61 }
  0x6a   :  { %1417 = vmatmul.mubr.f32.gmra.mxu0 %v1965_v63 }
  0x6b   :  { %1419 = vmatprep.mubr.f32.mxu0 %v1973_v1 }
  0x6e   :  { %1420 = vmatmul.mubr.f32.gmra.mxu0 %v1983_v3 }
  0x6f   :  { %1422 = vmatprep.mubr.f32.mxu0 %v1991_v5 }
  0x72   :  { %1423 = vmatmul.mubr.f32.gmra.mxu0 %v2001_v7 }
  0x73   :  { %1425 = vmatprep.mubr.f32.mxu0 %v2009_v9 }
  0x76   :  { %1426 = vmatmul.mubr.f32.gmra.mxu0 %v2019_v11 }
  0x77   :  { %1428 = vmatprep.mubr.f32.mxu0 %v2024_v12 }
  0x7a   :  { %1429 = vmatmul.mubr.f32.gmra.mxu0 %v2031_v13 }
  0x7b   :  { %1431 = vmatprep.mubr.f32.mxu0 %v2036_v14 }
  0x7e   :  { %1432 = vmatmul.mubr.f32.gmra.mxu0 %v2043_v15 }
  0xe2   :  { %v1364_v16 = vpop.f32.mrf.mxu0 }
  0xe4   :  { %v192_v17 = vpop.f32.mrf.mxu0 }
  0xe5   :  { %1579 = vtanh.f32 %v192_v17 }
  0xe6   :  { %1581 = vtanh.f32 %v1364_v16  ;;  %v1367_v18 = vpop.f32.mrf.mxu0 }
  0xe8   :  { %v202_v19 = vpop.f32.mrf.mxu0 }
  0xe9   :  { %1583 = vtanh.f32 %v202_v19 }
  0xea   :  { %1585 = vtanh.f32 %v1367_v18  ;;  %v1370_v20 = vpop.f32.mrf.mxu0 }
  0xec   :  { %v212_v21 = vpop.f32.mrf.mxu0 }
  0xed   :  { %1587 = vtanh.f32 %v212_v21 }
  0xee   :  { %1589 = vtanh.f32 %v1370_v20  ;;  %v1373_v22 = vpop.f32.mrf.mxu0 }
  0xf0   :  { %v222_v23 = vpop.f32.mrf.mxu0 }
  0xf1   :  { %1591 = vtanh.f32 %v222_v23 }
  0xf2   :  { %v1580_v24 = vpop.eup %1579  ;;  %1593 = vtanh.f32 %v1373_v22  ;;  %v1376_v25 = vpop.f32.mrf.mxu0 }
  0xf3   :  { %v1582_v26 = vpop.eup %1581  ;;  %1466 = vmatprep.mubr.f32.mxu1 %v1580_v24 }
  0xf4   :  { %v232_v27 = vpop.f32.mrf.mxu0  ;;  %1467 = vmatmul.mubr.f32.vlgmr.msra.gmra.mxu1 %v1582_v26 }
  0xf5   :  { %1595 = vtanh.f32 %v232_v27 }
  0xf6   :  { %v1584_v28 = vpop.eup %1583  ;;  %1597 = vtanh.f32 %v1376_v25  ;;  %v1379_v29 = vpop.f32.mrf.mxu0 }
  0xf7   :  { %v1586_v30 = vpop.eup %1585  ;;  %1469 = vmatprep.mubr.f32.mxu1 %v1584_v28 }
  0xf8   :  { %v242_v31 = vpop.f32.mrf.mxu0  ;;  %1470 = vmatmul.mubr.f32.gmra.mxu1 %v1586_v30 }
  0xf9   :  { %1599 = vtanh.f32 %v242_v31 }
  0xfa   :  { %v1588_v32 = vpop.eup %1587  ;;  %1601 = vtanh.f32 %v1379_v29  ;;  %v1382_v33 = vpop.f32.mrf.mxu0 }
  0xfb   :  { %v1590_v34 = vpop.eup %1589  ;;  %1472 = vmatprep.mubr.f32.mxu1 %v1588_v32 }
  0xfc   :  { %v252_v35 = vpop.f32.mrf.mxu0  ;;  %1473 = vmatmul.mubr.f32.gmra.mxu1 %v1590_v34 }
  0xfd   :  { %1603 = vtanh.f32 %v252_v35 }
  0xfe   :  { %v1592_v36 = vpop.eup %1591  ;;  %1605 = vtanh.f32 %v1382_v33  ;;  %v1385_v37 = vpop.f32.mrf.mxu0 }
  0xff   :  { %v1594_v38 = vpop.eup %1593  ;;  %1475 = vmatprep.mubr.f32.mxu1 %v1592_v36 }
 0x100   :  { %v262_v39 = vpop.f32.mrf.mxu0  ;;  %1476 = vmatmul.mubr.f32.gmra.mxu1 %v1594_v38 }
 0x101   :  { %1607 = vtanh.f32 %v262_v39 }
 0x102   :  { %v1596_v40 = vpop.eup %1595  ;;  %1609 = vtanh.f32 %v1385_v37  ;;  %v1388_v41 = vpop.f32.mrf.mxu0 }
 0x103   :  { %v1598_v42 = vpop.eup %1597  ;;  %1478 = vmatprep.mubr.f32.mxu1 %v1596_v40 }
 0x104   :  { %v272_v43 = vpop.f32.mrf.mxu0  ;;  %1479 = vmatmul.mubr.f32.gmra.mxu1 %v1598_v42 }
 0x105   :  { %1611 = vtanh.f32 %v272_v43 }
 0x106   :  { %v1600_v44 = vpop.eup %1599  ;;  %1613 = vtanh.f32 %v1388_v41  ;;  %v1391_v45 = vpop.f32.mrf.mxu0 }
 0x107   :  { %v1602_v46 = vpop.eup %1601  ;;  %1481 = vmatprep.mubr.f32.mxu1 %v1600_v44 }
 0x108   :  { %v282_v47 = vpop.f32.mrf.mxu0  ;;  %1482 = vmatmul.mubr.f32.gmra.mxu1 %v1602_v46 }
 0x109   :  { %1615 = vtanh.f32 %v282_v47 }
 0x10a   :  { %v1604_v48 = vpop.eup %1603  ;;  %1617 = vtanh.f32 %v1391_v45  ;;  %v1394_v49 = vpop.f32.mrf.mxu0 }
 0x10b   :  { %v1606_v50 = vpop.eup %1605  ;;  %1484 = vmatprep.mubr.f32.mxu1 %v1604_v48 }
 0x10c   :  { %v292_v51 = vpop.f32.mrf.mxu0  ;;  %1485 = vmatmul.mubr.f32.gmra.mxu1 %v1606_v50 }
 0x10d   :  { %1619 = vtanh.f32 %v292_v51 }
 0x10e   :  { %v1608_v52 = vpop.eup %1607  ;;  %1621 = vtanh.f32 %v1394_v49  ;;  %v1397_v53 = vpop.f32.mrf.mxu0 }
 0x10f   :  { %v1610_v54 = vpop.eup %1609  ;;  %1487 = vmatprep.mubr.f32.mxu1 %v1608_v52 }
 0x110   :  { %v302_v58 = vpop.f32.mrf.mxu0  ;;  %1488 = vmatmul.mubr.f32.gmra.mxu1 %v1610_v54 }
 0x111   :  { %1623 = vtanh.f32 %v302_v58 }
 0x112   :  { %v1612_v60 = vpop.eup %1611  ;;  %1625 = vtanh.f32 %v1397_v53  ;;  %v1400_v62 = vpop.f32.mrf.mxu0 }
 0x113   :  { %v1614_v0 = vpop.eup %1613  ;;  %1490 = vmatprep.mubr.f32.mxu1 %v1612_v60 }
 0x114   :  { %v312_v2 = vpop.f32.mrf.mxu0  ;;  %1491 = vmatmul.mubr.f32.gmra.mxu1 %v1614_v0 }
 0x115   :  { %1627 = vtanh.f32 %v312_v2 }
 0x116   :  { %v1616_v4 = vpop.eup %1615  ;;  %1629 = vtanh.f32 %v1400_v62  ;;  %v1403_v6 = vpop.f32.mrf.mxu0 }
 0x117   :  { %v1618_v8 = vpop.eup %1617  ;;  %1493 = vmatprep.mubr.f32.mxu1 %v1616_v4 }
 0x118   :  { %v322_v10 = vpop.f32.mrf.mxu0  ;;  %1494 = vmatmul.mubr.f32.gmra.mxu1 %v1618_v8 }
 0x119   :  { %1631 = vtanh.f32 %v322_v10 }
 0x11a   :  { %v1620_v16 = vpop.eup %1619  ;;  %1633 = vtanh.f32 %v1403_v6  ;;  %v1406_v17 = vpop.f32.mrf.mxu0 }
 0x11b   :  { %v1622_v18 = vpop.eup %1621  ;;  %1496 = vmatprep.mubr.f32.mxu1 %v1620_v16 }
 0x11c   :  { %v332_v19 = vpop.f32.mrf.mxu0  ;;  %1497 = vmatmul.mubr.f32.gmra.mxu1 %v1622_v18 }
 0x11d   :  { %1635 = vtanh.f32 %v332_v19 }
 0x11e   :  { %v1624_v20 = vpop.eup %1623  ;;  %1637 = vtanh.f32 %v1406_v17  ;;  %v1409_v21 = vpop.f32.mrf.mxu0 }
 0x11f   :  { %v1626_v22 = vpop.eup %1625  ;;  %1499 = vmatprep.mubr.f32.mxu1 %v1624_v20 }
 0x120   :  { %v342_v23 = vpop.f32.mrf.mxu0  ;;  %1500 = vmatmul.mubr.f32.gmra.mxu1 %v1626_v22 }
 0x121   :  { %1639 = vtanh.f32 %v342_v23 }
 0x122   :  { %v1628_v24 = vpop.eup %1627  ;;  %1641 = vtanh.f32 %v1409_v21  ;;  %v1412_v25 = vpop.f32.mrf.mxu0 }
 0x123   :  { %v1630_v26 = vpop.eup %1629  ;;  %1502 = vmatprep.mubr.f32.mxu1 %v1628_v24 }
 0x124   :  { %v352_v27 = vpop.f32.mrf.mxu0  ;;  %1503 = vmatmul.mubr.f32.gmra.mxu1 %v1630_v26 }
 0x125   :  { %1643 = vtanh.f32 %v352_v27 }
 0x126   :  { %v1632_v28 = vpop.eup %1631  ;;  %1645 = vtanh.f32 %v1412_v25  ;;  %v1415_v29 = vpop.f32.mrf.mxu0 }
 0x127   :  { %v1634_v30 = vpop.eup %1633  ;;  %1505 = vmatprep.mubr.f32.mxu1 %v1632_v28  ;;  %1647 = vtanh.f32 %v1415_v29 }
 0x128   :  { %v362_v31 = vpop.f32.mrf.mxu0  ;;  %1506 = vmatmul.mubr.f32.gmra.mxu1 %v1634_v30 }
 0x129   :  { %1649 = vtanh.f32 %v362_v31 }
 0x12a   :  { %v1636_v32 = vpop.eup %1635  ;;  %v1418_v33 = vpop.f32.mrf.mxu0 }
 0x12b   :  { %v1638_v34 = vpop.eup %1637  ;;  %1508 = vmatprep.mubr.f32.mxu1 %v1636_v32  ;;  %1651 = vtanh.f32 %v1418_v33 }
 0x12c   :  { %1509 = vmatmul.mubr.f32.gmra.mxu1 %v1638_v34  ;;  %v372_v35 = vpop.f32.mrf.mxu0 }
 0x12d   :  { %1653 = vtanh.f32 %v372_v35 }
 0x12e   :  { %v1640_v36 = vpop.eup %1639  ;;  %v1421_v37 = vpop.f32.mrf.mxu0 }
 0x12f   :  { %v1642_v38 = vpop.eup %1641  ;;  %1511 = vmatprep.mubr.f32.mxu1 %v1640_v36  ;;  %1655 = vtanh.f32 %v1421_v37 }
 0x130   :  { %1512 = vmatmul.mubr.f32.gmra.mxu1 %v1642_v38  ;;  %v382_v39 = vpop.f32.mrf.mxu0 }
 0x131   :  { %1657 = vtanh.f32 %v382_v39 }
 0x132   :  { %v1644_v40 = vpop.eup %1643  ;;  %v1424_v41 = vpop.f32.mrf.mxu0 }
 0x133   :  { %v1646_v42 = vpop.eup %1645  ;;  %1514 = vmatprep.mubr.f32.mxu1 %v1644_v40  ;;  %1659 = vtanh.f32 %v1424_v41 }
 0x134   :  { %1515 = vmatmul.mubr.f32.gmra.mxu1 %v1646_v42  ;;  %v392_v43 = vpop.f32.mrf.mxu0  ;;  %v1648_v44 = vpop.eup %1647 }
 0x135   :  { %1661 = vtanh.f32 %v392_v43 }
 0x136   :  { %v1650_v45 = vpop.eup %1649  ;;  %v1427_v46 = vpop.f32.mrf.mxu0 }
 0x137   :  { %1517 = vmatprep.mubr.f32.mxu1 %v1650_v45  ;;  %1663 = vtanh.f32 %v1427_v46 }
 0x138   :  { %1518 = vmatmul.mubr.f32.gmra.mxu1 %v1648_v44  ;;  %v402_v47 = vpop.f32.mrf.mxu0  ;;  %v1652_v48 = vpop.eup %1651 }
 0x139   :  { %1665 = vtanh.f32 %v402_v47 }
 0x13a   :  { %v1654_v49 = vpop.eup %1653  ;;  %v1430_v50 = vpop.f32.mrf.mxu0 }
 0x13b   :  { %1520 = vmatprep.mubr.f32.mxu1 %v1654_v49  ;;  %1667 = vtanh.f32 %v1430_v50  ;;  %v1683_v50 = vmov -inf  }
 0x13c   :  { %1521 = vmatmul.mubr.f32.gmra.mxu1 %v1652_v48  ;;  %v412_v51 = vpop.f32.mrf.mxu0  ;;  %v1656_v52 = vpop.eup %1655  ;;  %59 = vst.msk [vmem:[#allocation2] sm:$0xff] %vm58_vm0, %v1683_v50 }
 0x13d   :  { %1669 = vtanh.f32 %v412_v51 }
 0x13e   :  { %v1658_v53 = vpop.eup %1657  ;;  %v1433_v54 = vpop.f32.mrf.mxu0 }
 0x13f   :  { %1523 = vmatprep.mubr.f32.mxu1 %v1658_v53  ;;  %1671 = vtanh.f32 %v1433_v54 }
 0x140   :  { %1524 = vmatmul.mubr.f32.gmra.mxu1 %v1656_v52  ;;  %v422_v58 = vpop.f32.mrf.mxu0  ;;  %v1660_v60 = vpop.eup %1659 }
 0x141   :  { %1673 = vtanh.f32 %v422_v58 }
 0x142   :  { %v1662_v62 = vpop.eup %1661 }
 0x143   :  { %1526 = vmatprep.mubr.f32.mxu1 %v1662_v62 }
 0x144   :  { %1527 = vmatmul.mubr.f32.gmra.mxu1 %v1660_v60  ;;  %v1664_v0 = vpop.eup %1663 }
 0x146   :  { %v1666_v2 = vpop.eup %1665 }
 0x147   :  { %1529 = vmatprep.mubr.f32.mxu1 %v1666_v2 }
 0x148   :  { %1530 = vmatmul.mubr.f32.gmra.mxu1 %v1664_v0  ;;  %v1668_v4 = vpop.eup %1667 }
 0x14a   :  { %v1670_v6 = vpop.eup %1669 }
 0x14b   :  { %1532 = vmatprep.mubr.f32.mxu1 %v1670_v6 }
 0x14c   :  { %1533 = vmatmul.mubr.f32.gmra.mxu1 %v1668_v4  ;;  %v1672_v8 = vpop.eup %1671 }
 0x14e   :  { %v1674_v10 = vpop.eup %1673 }
 0x14f   :  { %1535 = vmatprep.mubr.f32.mxu1 %v1674_v10 }
 0x150   :  { %1536 = vmatmul.mubr.f32.gmra.mxu1 %v1672_v8 }
 0x1b4   :  { %v1468_v16 = vpop.f32.mrf.mxu1 }
 0x1b6   :  { %v561_v17 = vpop.f32.mrf.mxu1 }
 0x1b7   :  { %800 = vxpose.xlu0.b32.start [1/16] (narrow) %v561_v17, 8 }
 0x1b8   :  { %v1471_v18 = vpop.f32.mrf.mxu1 }
 0x1ba   :  { %v571_v19 = vpop.f32.mrf.mxu1 }
 0x1bb   :  { %801 = vxpose.xlu0.b32.cont [2/16] (narrow) %v1468_v16, 8 }
 0x1bc   :  { %v1474_v20 = vpop.f32.mrf.mxu1 }
 0x1be   :  { %v581_v21 = vpop.f32.mrf.mxu1 }
 0x1bf   :  { %802 = vxpose.xlu0.b32.cont [3/16] (narrow) %v571_v19, 8  ;;  %v898_v19 = vlaneseq }
 0x1c0   :  { %v1477_v22 = vpop.f32.mrf.mxu1 }
 0x1c2   :  { %v591_v23 = vpop.f32.mrf.mxu1 }
 0x1c3   :  { %803 = vxpose.xlu0.b32.cont [4/16] (narrow) %v1471_v18, 8 }
 0x1c4   :  { %v1480_v24 = vpop.f32.mrf.mxu1 }
 0x1c6   :  { %v601_v25 = vpop.f32.mrf.mxu1 }
 0x1c7   :  { %804 = vxpose.xlu0.b32.cont [5/16] (narrow) %v581_v21, 8 }
 0x1c8   :  { %v1483_v26 = vpop.f32.mrf.mxu1 }
 0x1ca   :  { %v611_v27 = vpop.f32.mrf.mxu1 }
 0x1cb   :  { %805 = vxpose.xlu0.b32.cont [6/16] (narrow) %v1474_v20, 8  ;;  %v899_v20 = vand.u32 127, %v898_v19 }
 0x1cc   :  { %v1486_v28 = vpop.f32.mrf.mxu1 }
 0x1cd   :  { %v901_v21 = vadd.s32 256, %v899_v20 }
 0x1ce   :  { %v621_v29 = vpop.f32.mrf.mxu1 }
 0x1cf   :  { %806 = vxpose.xlu0.b32.cont [7/16] (narrow) %v591_v23, 8  ;;  %vm908_vm1 = vcmp.lt.s32.totalorder %v901_v21, 300 }
 0x1d0   :  { %v1489_v30 = vpop.f32.mrf.mxu1 }
 0x1d2   :  { %v631_v31 = vpop.f32.mrf.mxu1 }
 0x1d3   :  { %807 = vxpose.xlu0.b32.cont [8/16] (narrow) %v1477_v22, 8 }
 0x1d4   :  { %v1492_v32 = vpop.f32.mrf.mxu1 }
 0x1d6   :  { %v641_v33 = vpop.f32.mrf.mxu1 }
 0x1d7   :  { %808 = vxpose.xlu0.b32.cont [9/16] (narrow) %v601_v25, 8  ;;  %832 = vxpose.xlu1.b32.start [1/16] (narrow) %v641_v33, 8 }
 0x1d8   :  { %v1495_v34 = vpop.f32.mrf.mxu1 }
 0x1da   :  { %v651_v35 = vpop.f32.mrf.mxu1 }
 0x1db   :  { %809 = vxpose.xlu0.b32.cont [10/16] (narrow) %v1480_v24, 8  ;;  %833 = vxpose.xlu1.b32.cont [2/16] (narrow) %v1492_v32, 8 }
 0x1dc   :  { %v1498_v36 = vpop.f32.mrf.mxu1 }
 0x1de   :  { %v661_v37 = vpop.f32.mrf.mxu1 }
 0x1df   :  { %810 = vxpose.xlu0.b32.cont [11/16] (narrow) %v611_v27, 8  ;;  %834 = vxpose.xlu1.b32.cont [3/16] (narrow) %v651_v35, 8  ;;  %v1685_v27 = vmov 0.0  }
 0x1e0   :  { %v1501_v38 = vpop.f32.mrf.mxu1  ;;  %1538 = vmatprep.subr.mxu1 %v1685_v27  ;;  %60 = vst.msk [vmem:[#allocation3] sm:$0xff] %vm58_vm0, %v1685_v27  ;;  %1570 = vmatprep.mubr.msk.f32.mxu1 %vm1686_vm2, %v1685_v27 }
 0x1e1   :  { %1539 = vmatpush3.msra.mxu1 %v2043_v15 }
 0x1e2   :  { %v671_v39 = vpop.f32.mrf.mxu1  ;;  %1540 = vmatprep.subr.mxu1 %v1685_v27 }
 0x1e3   :  { %811 = vxpose.xlu0.b32.cont [12/16] (narrow) %v1483_v26, 8  ;;  %835 = vxpose.xlu1.b32.cont [4/16] (narrow) %v1495_v34, 8  ;;  %v1684_v26 = vmov 0  }
 0x1e4   :  { %v1504_v40 = vpop.f32.mrf.mxu1  ;;  %1541 = vmatpush3.msra.mxu1 %v2036_v14 }
 0x1e5   :  { %1542 = vmatprep.subr.mxu1 %v1685_v27 }
 0x1e6   :  { %v681_v41 = vpop.f32.mrf.mxu1  ;;  %1543 = vmatpush3.msra.mxu1 %v2031_v13 }
 0x1e7   :  { %812 = vxpose.xlu0.b32.cont [13/16] (narrow) %v621_v29, 8  ;;  %836 = vxpose.xlu1.b32.cont [5/16] (narrow) %v661_v37, 8 }
 0x1e8   :  { %v1507_v42 = vpop.f32.mrf.mxu1  ;;  %1544 = vmatprep.subr.mxu1 %v1685_v27 }
 0x1e9   :  { %1545 = vmatpush3.msra.mxu1 %v2024_v12 }
 0x1ea   :  { %v691_v43 = vpop.f32.mrf.mxu1  ;;  %1546 = vmatprep.subr.mxu1 %v1685_v27 }
 0x1eb   :  { %813 = vxpose.xlu0.b32.cont [14/16] (narrow) %v1486_v28, 8  ;;  %837 = vxpose.xlu1.b32.cont [6/16] (narrow) %v1498_v36, 8 }
 0x1ec   :  { %v1510_v44 = vpop.f32.mrf.mxu1  ;;  %1547 = vmatpush3.msra.mxu1 %v2019_v11 }
 0x1ed   :  { %1548 = vmatprep.subr.mxu1 %v1685_v27 }
 0x1ee   :  { %v701_v45 = vpop.f32.mrf.mxu1  ;;  %1549 = vmatpush3.msra.mxu1 %v2009_v9 }
 0x1ef   :  { %814 = vxpose.xlu0.b32.cont [15/16] (narrow) %v631_v31, 8  ;;  %838 = vxpose.xlu1.b32.cont [7/16] (narrow) %v671_v39, 8  ;;  %v938_v31 = vld [vmem:[#allocation3] sm:$0xff] }
 0x1f0   :  { %v1513_v46 = vpop.f32.mrf.mxu1  ;;  %1550 = vmatprep.subr.mxu1 %v1685_v27 }
 0x1f1   :  { %1551 = vmatpush3.msra.mxu1 %v2001_v7 }
 0x1f2   :  { %v711_v47 = vpop.f32.mrf.mxu1  ;;  %1552 = vmatprep.subr.mxu1 %v1685_v27 }
 0x1f3   :  { %815 = vxpose.xlu0.b32.end [16/16] (narrow) %v1489_v30, 8  ;;  %839 = vxpose.xlu1.b32.cont [8/16] (narrow) %v1501_v38, 8 }
 0x1f4   :  { %v1516_v48 = vpop.f32.mrf.mxu1  ;;  %1553 = vmatpush3.msra.mxu1 %v1991_v5 }
 0x1f5   :  { %1554 = vmatprep.subr.mxu1 %v1685_v27 }
 0x1f6   :  { %v721_v49 = vpop.f32.mrf.mxu1  ;;  %1555 = vmatpush3.msra.mxu1 %v1983_v3  ;;  %v915_v3 = vld [vmem:[#allocation2] sm:$0xff] }
 0x1f7   :  { %840 = vxpose.xlu1.b32.cont [9/16] (narrow) %v681_v41, 8  ;;  %864 = vxpose.xlu0.b32.start [1/16] (narrow) %v721_v49, 8 }
 0x1f8   :  { %v1519_v51 = vpop.f32.mrf.mxu1  ;;  %1556 = vmatprep.subr.mxu1 %v1685_v27 }
 0x1f9   :  { %1557 = vmatpush3.msra.mxu1 %v1973_v1 }
 0x1fa   :  { %v731_v52 = vpop.f32.mrf.mxu1  ;;  %1558 = vmatprep.subr.mxu1 %v1685_v27 }
 0x1fb   :  { %841 = vxpose.xlu1.b32.cont [10/16] (narrow) %v1504_v40, 8  ;;  %865 = vxpose.xlu0.b32.cont [2/16] (narrow) %v1516_v48, 8 }
 0x1fc   :  { %v1522_v53 = vpop.f32.mrf.mxu1  ;;  %1559 = vmatpush3.msra.mxu1 %v1965_v63 }
 0x1fd   :  { %1560 = vmatprep.subr.mxu1 %v1685_v27 }
 0x1fe   :  { %v741_v54 = vpop.f32.mrf.mxu1  ;;  %1561 = vmatpush3.msra.mxu1 %v1955_v61 }
 0x1ff   :  { %842 = vxpose.xlu1.b32.cont [11/16] (narrow) %v691_v43, 8  ;;  %866 = vxpose.xlu0.b32.cont [3/16] (narrow) %v731_v52, 8 }
 0x200   :  { %v1525_v58 = vpop.f32.mrf.mxu1  ;;  %1562 = vmatprep.subr.mxu1 %v1685_v27 }
 0x201   :  { %1563 = vmatpush3.msra.mxu1 %v1947_v59 }
 0x202   :  { %v751_v60 = vpop.f32.mrf.mxu1  ;;  %1564 = vmatprep.subr.mxu1 %v1685_v27 }
 0x203   :  { %843 = vxpose.xlu1.b32.cont [12/16] (narrow) %v1507_v42, 8  ;;  %867 = vxpose.xlu0.b32.cont [4/16] (narrow) %v1519_v51, 8 }
 0x204   :  { %v1528_v62 = vpop.f32.mrf.mxu1  ;;  %1565 = vmatpush3.msra.mxu1 %v1937_v57 }
 0x205   :  { %1566 = vmatprep.subr.mxu1 %v1685_v27 }
 0x206   :  { %v761_v0 = vpop.f32.mrf.mxu1  ;;  %1567 = vmatpush3.msra.mxu1 %v1932_v56 }
 0x207   :  { %844 = vxpose.xlu1.b32.cont [13/16] (narrow) %v701_v45, 8  ;;  %868 = vxpose.xlu0.b32.cont [5/16] (narrow) %v741_v54, 8 }
 0x208   :  { %v1531_v2 = vpop.f32.mrf.mxu1  ;;  %1568 = vmatprep.subr.mxu1 %v1685_v27 }
 0x209   :  { %1569 = vmatpush3.msra.mxu1 %v1925_v55 }
 0x20a   :  { %v771_v4 = vpop.f32.mrf.mxu1 }
 0x20b   :  { %845 = vxpose.xlu1.b32.cont [14/16] (narrow) %v1510_v44, 8  ;;  %869 = vxpose.xlu0.b32.cont [6/16] (narrow) %v1522_v53, 8 }
 0x20c   :  { %v1534_v6 = vpop.f32.mrf.mxu1 }
 0x20e   :  { %v781_v8 = vpop.f32.mrf.mxu1 }
 0x20f   :  { %846 = vxpose.xlu1.b32.cont [15/16] (narrow) %v711_v47, 8  ;;  %870 = vxpose.xlu0.b32.cont [7/16] (narrow) %v751_v60, 8 }
 0x210   :  { %v1537_v10 = vpop.f32.mrf.mxu1 }
 0x212   :  { %v791_v16 = vpop.f32.mrf.mxu1 }
 0x213   :  { %847 = vxpose.xlu1.b32.end [16/16] (narrow) %v1513_v46, 8  ;;  %871 = vxpose.xlu0.b32.cont [8/16] (narrow) %v1525_v58, 8 }
 0x217   :  { %872 = vxpose.xlu0.b32.cont [9/16] (narrow) %v761_v0, 8 }
 0x21b   :  { %873 = vxpose.xlu0.b32.cont [10/16] (narrow) %v1528_v62, 8 }
 0x21f   :  { %874 = vxpose.xlu0.b32.cont [11/16] (narrow) %v771_v4, 8 }
 0x223   :  { %875 = vxpose.xlu0.b32.cont [12/16] (narrow) %v1531_v2, 8 }
 0x227   :  { %876 = vxpose.xlu0.b32.cont [13/16] (narrow) %v781_v8, 8 }
 0x22b   :  { %877 = vxpose.xlu0.b32.cont [14/16] (narrow) %v1534_v6, 8 }
 0x22f   :  { %878 = vxpose.xlu0.b32.cont [15/16] (narrow) %v791_v16, 8 }
 0x231   :  { %1577 = vset.pattern.permute.xlu1 %v1684_v26 }
 0x233   :  { %879 = vxpose.xlu0.b32.end [16/16] (narrow) %v1537_v10, 8  ;;  %v2047_v17 = vpop.trf.xlu0 }
 0x234   :  { %912 = vst [vmem:[%s2099_s3] sm:$0xff] %v2047_v17 }
 0x253   :  { %v2053_v18 = vpop.trf.xlu1 }
 0x254   :  { %913 = vst [vmem:[%s2099_s3 + $0x8] sm:$0xff] %v2053_v18  ;;  %v916_v23 = vmax.f32 %v2047_v17, %v2053_v18 }
 0x25c   :  { %1578 = vset.pattern.permute.xlu0 %v1684_v26 }
 0x273   :  { %v880_v22 = vpop.trf.xlu0 }
 0x274   :  { %v911_v24 = vsel %vm908_vm1, %v880_v22, -1e+30 }
 0x275   :  { %914 = vst [vmem:[%s2099_s3 + $0x10] sm:$0xff] %v911_v24  ;;  %v917_v25 = vmax.f32 %v916_v23, %v911_v24 }
 0x277   :  { %918 = vmax.xlane.f32.xlu1 %v917_v25 }
 0x300   :  { %v919_v1 = vpop.xlane.xlu1 %918 }
 0x301   :  { %v920_v5 = vmax.f32 %v915_v3, %v919_v1 }
 0x303   :  { %v921_v7 = vsub.f32 %v915_v3, %v920_v5  ;;  %1096 = vst.msk [vmem:[#allocation2] sm:$0xff] %vm58_vm0, %v920_v5  ;;  %926 = vperm.xlu1 %1577, %v920_v5  }
 0x305   :  { %v922_v61 = vmul.f32 1.442695, %v921_v7 }
 0x307   :  { %1675 = vpow2.f32 %v922_v61 }
 0x30a   :  { %v1102_v59 = vld [vmem:[#allocation2] sm:$0xff] }
 0x30b   :  { %1103 = vst.msk [vmem:[%s2100_s5] sm:$0xff] %vm58_vm0, %v1102_v59 }
 0x314   :  { %v1676_v56 = vpop.eup %1675 }
 0x315   :  { %950 = vperm.xlu0 %1578, %v1676_v56   ;;  %v939_v32 = vmul.f32 %v1676_v56, %v938_v31 }
 0x37e   :  { %v927_v55 = vpop.permute.xlu1 %926 }
 0x37f   :  { %v929_v57 = vsub.f32 %v2047_v17, %v927_v55  ;;  %v930_v63 = vsub.f32 %v2053_v18, %v927_v55  ;;  %v931_v9 = vsub.f32 %v911_v24, %v927_v55 }
 0x381   :  { %v932_v11 = vmul.f32 1.442695, %v929_v57  ;;  %v934_v12 = vmul.f32 1.442695, %v930_v63  ;;  %v936_v13 = vmul.f32 1.442695, %v931_v9 }
 0x383   :  { %1677 = vpow2.f32 %v932_v11 }
 0x384   :  { %1679 = vpow2.f32 %v934_v12 }
 0x385   :  { %1681 = vpow2.f32 %v936_v13 }
 0x390   :  { %v1678_v14 = vpop.eup %1677  ;;  %v951_v38 = vpop.permute.xlu0 %950 }
 0x391   :  { %v1680_v15 = vpop.eup %1679  ;;  %v953_v42 = vmul.f32 0.0, %v951_v38 }
 0x392   :  { %v1682_v28 = vpop.eup %1681  ;;  %1018 = vmatprep.mubr.f32.mxu0 %v1680_v15  ;;  %v940_v29 = vadd.f32 %v1680_v15, %v1678_v14 }
 0x393   :  { %1571 = vmatmul.mubr.f32.vlgmr.msra.gmra.mxu1 %v1682_v28  ;;  %1019 = vmatmul.mubr.f32.vlgmr.msra.gmra.mxu0 %v1678_v14 }
 0x394   :  { %v941_v30 = vadd.f32 %v1682_v28, %v940_v29 }
 0x396   :  { %942 = vadd.xlane.f32.xlu1 %v941_v30 }
 0x41f   :  { %v943_v33 = vpop.xlane.xlu1 %942 }
 0x420   :  { %v944_v34 = vadd.f32 %v943_v33, %v939_v32 }
 0x422   :  { %946 = vst.msk [vmem:[#allocation3] sm:$0xff] %vm58_vm0, %v944_v34 }
 0x429   :  { %v1104_v35 = vld [vmem:[#allocation3] sm:$0xff] }
 0x42a   :  { %1105 = vst.msk [vmem:[%s2101_s6] sm:$0xff] %vm58_vm0, %v1104_v35 }
 0x453   :  { %v1090_v36 = vpop.f32.mrf.mxu1  ;;  %v1310_v37 = vpop.f32.mrf.mxu0 }
 0x455   :  { %v1572_v39 = vpop.f32.mrf.mxu1  ;;  %v1311_v40 = vpop.f32.mrf.mxu0 }
 0x456   :  { %v1312_v41 = vadd.f32 %v1311_v40, %v1310_v37 }
 0x458   :  { %v1091_v43 = vadd.f32 %v1312_v41, %v1090_v36 }
 0x45a   :  { %v1094_v44 = vadd.f32 %v1091_v43, %v953_v42 }
 0x45c   :  { %1101 = vst [vmem:[%s2102_s4] sm:$0xff] %v1094_v44 }

</bundles_post_ra>
